<compile_context>
chip_gen: v6e
topology: v6e:2x2x1
jax: 0.10.0
libtpu: 0.0.40
codegen_flags: <defaults>
</compile_context>

<pallas_src>
import math

import jax
import jax.numpy as jnp
from jax.experimental import pallas as pl
from jax.experimental.pallas import tpu as pltpu

# Problem sizes implied by the module (small, deterministic).
D_MODEL = 32
MLP_RATIO = 4
DIM_FF = D_MODEL * MLP_RATIO      # 128
SEQ = 8
BATCH = 2
LN_EPS = 1e-5
_INV_SQRT2 = 0.7071067811865476


def _erf(x):
    """Abramowitz & Stegun 7.1.26 polynomial approximation, |err| <= 1.5e-7."""
    p = 0.3275911
    a1, a2, a3, a4, a5 = (0.254829592, -0.284496736, 1.421413741,
                          -1.453152027, 1.061405429)
    ax = jnp.abs(x)
    t = 1.0 / (1.0 + p * ax)
    poly = ((((a5 * t + a4) * t + a3) * t + a2) * t + a1) * t
    e = 1.0 - poly * jnp.exp(-ax * ax)
    return jnp.where(x < 0.0, -e, e)


def _gelu_exact(x):
    return 0.5 * x * (1.0 + _erf(x * _INV_SQRT2))


def _ffn_layer_kernel(x_ref, w1_ref, b1_ref, w2_ref, vec_ref, o_ref):
    """Single invocation: x_ref is the full flattened (N, D) token slab.

    vec_ref packs [b2; gamma; beta] as a (3, D) array.
    """
    x = x_ref[...]                                    # (N, D)

    # linear1 + exact GELU  (dropout = 0 -> identity)
    h = jnp.dot(x, w1_ref[...], preferred_element_type=jnp.float32) \
        + b1_ref[...]                                 # (N, 4D)
    h = _gelu_exact(h)

    # linear2
    vec = vec_ref[...]                                # (3, D)
    y = jnp.dot(h, w2_ref[...], preferred_element_type=jnp.float32) \
        + vec[0:1, :]                                 # (N, D)

    # residual + LayerNorm (forward_post)
    y = x + y
    mean = jnp.mean(y, axis=-1, keepdims=True)
    var = jnp.mean((y - mean) ** 2, axis=-1, keepdims=True)
    y_norm = (y - mean) * jax.lax.rsqrt(var + LN_EPS)
    o_ref[...] = y_norm * vec[1:2, :] + vec[2:3, :]

    # TODO(synk): output stays 32 lanes wide (d_model=32); a 128-lane-dense
    # output slab would need an in-kernel relayout that costs more than the
    # masked stores it removes at this footprint.


def ffn_layer(tgt, params):
    """tgt: (L, B, D) float32. Returns (L, B, D). Matches forward_post."""
    L, B, D = tgt.shape
    x = tgt.reshape(L * B, D)                         # free, contiguous
    w1, b1, w2, vec = params

    vmem = pl.BlockSpec(memory_space=pltpu.MemorySpace.VMEM)
    out = pl.pallas_call(
        _ffn_layer_kernel,
        out_shape=jax.ShapeDtypeStruct((L * B, D), jnp.float32),
        in_specs=[vmem, vmem, vmem, vmem, vmem],
        out_specs=vmem,
    )(x, w1, b1, w2, vec)

    return out.reshape(L, B, D)


def _xavier_uniform(key, shape):
    fan_in, fan_out = shape
    bound = math.sqrt(6.0 / (fan_in + fan_out))
    return jax.random.uniform(key, shape, jnp.float32, -bound, bound)


def init_params(key):
    """Synthetic deterministic parameters (weights stored as (in, out))."""
    k1, k2, k3, k4 = jax.random.split(key, 4)
    w1 = _xavier_uniform(k1, (D_MODEL, DIM_FF))
    w2 = _xavier_uniform(k2, (DIM_FF, D_MODEL))
    b1 = 0.02 * jax.random.normal(k3, (1, DIM_FF), jnp.float32)
    b2 = 0.02 * jax.random.normal(k4, (D_MODEL,), jnp.float32)
    gamma = jnp.ones((D_MODEL,), jnp.float32)
    beta = jnp.zeros((D_MODEL,), jnp.float32)
    vec = jnp.stack([b2, gamma, beta], axis=0)        # (3, D) packed vectors
    return (w1, b1, w2, vec)


def reference_forward(tgt, params):
    """Pure-JAX reference mirroring the PyTorch forward_post semantics."""
    w1, b1, w2, vec = params
    b2, gamma, beta = vec[0], vec[1], vec[2]
    h = tgt @ w1 + b1[0]
    h = 0.5 * h * (1.0 + jax.scipy.special.erf(h * _INV_SQRT2))   # exact GELU
    y = h @ w2 + b2
    y = tgt + y
    mean = jnp.mean(y, axis=-1, keepdims=True)
    var = jnp.mean((y - mean) ** 2, axis=-1, keepdims=True)
    return (y - mean) / jnp.sqrt(var + LN_EPS) * gamma + beta


if __name__ == "__main__":
    key = jax.random.PRNGKey(0)
    k_tgt, k_par = jax.random.split(key, 2)

    tgt = jax.random.normal(k_tgt, (SEQ, BATCH, D_MODEL), jnp.float32)
    params = init_params(k_par)

    out = jax.block_until_ready(ffn_layer(tgt, params))
    ref = jax.block_until_ready(reference_forward(tgt, params))

    assert out.shape == (SEQ, BATCH, D_MODEL)
    assert jnp.allclose(out, ref, atol=2e-4, rtol=2e-4), "mismatch vs reference"

    print("KERNEL_OK")
</pallas_src>

<mosaic_0001>
module attributes {stable_mosaic.version = 11 : i64} {
  func.func @_ffn_layer_kernel(%arg0: memref<16x32xf32, #tpu.memory_space<vmem>>, %arg1: memref<32x128xf32, #tpu.memory_space<vmem>>, %arg2: memref<1x128xf32, #tpu.memory_space<vmem>>, %arg3: memref<128x32xf32, #tpu.memory_space<vmem>>, %arg4: memref<3x32xf32, #tpu.memory_space<vmem>>, %arg5: memref<16x32xf32, #tpu.memory_space<vmem>>) attributes {dimension_semantics = [], scalar_prefetch = 0 : i64, scratch_operands = 0 : i64, tpu.core_type = #tpu.core_type<tc>} {
    %c0 = arith.constant 0 : index
    %c0_0 = arith.constant 0 : index
    %0 = vector.load %arg0[%c0, %c0_0] : memref<16x32xf32, #tpu.memory_space<vmem>>, vector<16x32xf32>
    %c0_1 = arith.constant 0 : index
    %c0_2 = arith.constant 0 : index
    %1 = vector.load %arg1[%c0_1, %c0_2] : memref<32x128xf32, #tpu.memory_space<vmem>>, vector<32x128xf32>
    %cst = arith.constant dense<0.000000e+00> : vector<16x128xf32>
    %2 = tpu.matmul %0, %1, %cst {dimension_numbers = #tpu.dot_dimension_numbers<[1], [0], [0], [1], [0, 0, 1, 1], [], []>} : vector<16x32xf32>, vector<32x128xf32>, vector<16x128xf32> -> vector<16x128xf32>
    %c0_3 = arith.constant 0 : index
    %c0_4 = arith.constant 0 : index
    %3 = vector.load %arg2[%c0_3, %c0_4] : memref<1x128xf32, #tpu.memory_space<vmem>>, vector<1x128xf32>
    %4 = vector.broadcast %3 : vector<1x128xf32> to vector<16x128xf32>
    %5 = arith.addf %2, %4 : vector<16x128xf32>
    %cst_5 = arith.constant 5.000000e-01 : f32
    %6 = vector.broadcast %cst_5 : f32 to vector<16x128xf32>
    %7 = arith.mulf %6, %5 : vector<16x128xf32>
    %cst_6 = arith.constant 0.707106769 : f32
    %8 = vector.broadcast %cst_6 : f32 to vector<16x128xf32>
    %9 = arith.mulf %5, %8 : vector<16x128xf32>
    %10 = math.absf %9 : vector<16x128xf32>
    %cst_7 = arith.constant 0.327591091 : f32
    %11 = vector.broadcast %cst_7 : f32 to vector<16x128xf32>
    %12 = arith.mulf %11, %10 : vector<16x128xf32>
    %cst_8 = arith.constant 1.000000e+00 : f32
    %13 = vector.broadcast %cst_8 : f32 to vector<16x128xf32>
    %14 = arith.addf %13, %12 : vector<16x128xf32>
    %cst_9 = arith.constant 1.000000e+00 : f32
    %15 = vector.broadcast %cst_9 : f32 to vector<16x128xf32>
    %16 = arith.divf %15, %14 : vector<16x128xf32>
    %cst_10 = arith.constant 1.06140542 : f32
    %17 = vector.broadcast %cst_10 : f32 to vector<16x128xf32>
    %18 = arith.mulf %17, %16 : vector<16x128xf32>
    %cst_11 = arith.constant -1.45315206 : f32
    %19 = vector.broadcast %cst_11 : f32 to vector<16x128xf32>
    %20 = arith.addf %18, %19 : vector<16x128xf32>
    %21 = arith.mulf %20, %16 : vector<16x128xf32>
    %cst_12 = arith.constant 1.42141378 : f32
    %22 = vector.broadcast %cst_12 : f32 to vector<16x128xf32>
    %23 = arith.addf %21, %22 : vector<16x128xf32>
    %24 = arith.mulf %23, %16 : vector<16x128xf32>
    %cst_13 = arith.constant -0.284496725 : f32
    %25 = vector.broadcast %cst_13 : f32 to vector<16x128xf32>
    %26 = arith.addf %24, %25 : vector<16x128xf32>
    %27 = arith.mulf %26, %16 : vector<16x128xf32>
    %cst_14 = arith.constant 0.254829586 : f32
    %28 = vector.broadcast %cst_14 : f32 to vector<16x128xf32>
    %29 = arith.addf %27, %28 : vector<16x128xf32>
    %30 = arith.mulf %29, %16 : vector<16x128xf32>
    %cst_15 = arith.constant 0.000000e+00 : f32
    %31 = vector.broadcast %cst_15 : f32 to vector<16x128xf32>
    %32 = arith.subf %31, %10 : vector<16x128xf32>
    %33 = arith.mulf %32, %10 : vector<16x128xf32>
    %34 = math.exp %33 : vector<16x128xf32>
    %35 = arith.mulf %30, %34 : vector<16x128xf32>
    %cst_16 = arith.constant 1.000000e+00 : f32
    %36 = vector.broadcast %cst_16 : f32 to vector<16x128xf32>
    %37 = arith.subf %36, %35 : vector<16x128xf32>
    %cst_17 = arith.constant 0.000000e+00 : f32
    %38 = vector.broadcast %cst_17 : f32 to vector<16x128xf32>
    %39 = arith.cmpf olt, %9, %38 : vector<16x128xf32>
    %cst_18 = arith.constant 0.000000e+00 : f32
    %40 = vector.broadcast %cst_18 : f32 to vector<16x128xf32>
    %41 = arith.subf %40, %37 : vector<16x128xf32>
    %42 = arith.select %39, %41, %37 : vector<16x128xi1>, vector<16x128xf32>
    %cst_19 = arith.constant 1.000000e+00 : f32
    %43 = vector.broadcast %cst_19 : f32 to vector<16x128xf32>
    %44 = arith.addf %43, %42 : vector<16x128xf32>
    %45 = arith.mulf %7, %44 : vector<16x128xf32>
    %c0_20 = arith.constant 0 : index
    %c0_21 = arith.constant 0 : index
    %46 = vector.load %arg4[%c0_20, %c0_21] : memref<3x32xf32, #tpu.memory_space<vmem>>, vector<3x32xf32>
    %c0_22 = arith.constant 0 : index
    %c0_23 = arith.constant 0 : index
    %47 = vector.load %arg3[%c0_22, %c0_23] : memref<128x32xf32, #tpu.memory_space<vmem>>, vector<128x32xf32>
    %cst_24 = arith.constant dense<0.000000e+00> : vector<16x32xf32>
    %48 = tpu.matmul %45, %47, %cst_24 {dimension_numbers = #tpu.dot_dimension_numbers<[1], [0], [0], [1], [0, 0, 1, 1], [], []>} : vector<16x128xf32>, vector<128x32xf32>, vector<16x32xf32> -> vector<16x32xf32>
    %49 = vector.extract_strided_slice %46 {offsets = [0, 0], sizes = [1, 32], strides = [1, 1]} : vector<3x32xf32> to vector<1x32xf32>
    %50 = vector.broadcast %49 : vector<1x32xf32> to vector<16x32xf32>
    %51 = arith.addf %48, %50 : vector<16x32xf32>
    %52 = arith.addf %0, %51 : vector<16x32xf32>
    %cst_25 = arith.constant dense<0.000000e+00> : vector<16xf32>
    %53 = vector.multi_reduction <add>, %52, %cst_25 [1] : vector<16x32xf32> to vector<16xf32>
    %54 = vector.shape_cast %53 : vector<16xf32> to vector<16x1xf32>
    %cst_26 = arith.constant 3.200000e+01 : f32
    %55 = vector.broadcast %cst_26 : f32 to vector<16x1xf32>
    %56 = arith.divf %54, %55 : vector<16x1xf32>
    %57 = vector.broadcast %56 : vector<16x1xf32> to vector<16x32xf32>
    %58 = arith.subf %52, %57 : vector<16x32xf32>
    %59 = arith.mulf %58, %58 : vector<16x32xf32>
    %cst_27 = arith.constant dense<0.000000e+00> : vector<16xf32>
    %60 = vector.multi_reduction <add>, %59, %cst_27 [1] : vector<16x32xf32> to vector<16xf32>
    %61 = vector.shape_cast %60 : vector<16xf32> to vector<16x1xf32>
    %cst_28 = arith.constant 3.200000e+01 : f32
    %62 = vector.broadcast %cst_28 : f32 to vector<16x1xf32>
    %63 = arith.divf %61, %62 : vector<16x1xf32>
    %64 = vector.broadcast %56 : vector<16x1xf32> to vector<16x32xf32>
    %65 = arith.subf %52, %64 : vector<16x32xf32>
    %cst_29 = arith.constant 9.99999974E-6 : f32
    %66 = vector.broadcast %cst_29 : f32 to vector<16x1xf32>
    %67 = arith.addf %63, %66 : vector<16x1xf32>
    %68 = math.rsqrt %67 : vector<16x1xf32>
    %69 = vector.broadcast %68 : vector<16x1xf32> to vector<16x32xf32>
    %70 = arith.mulf %65, %69 : vector<16x32xf32>
    %71 = vector.extract_strided_slice %46 {offsets = [1, 0], sizes = [1, 32], strides = [1, 1]} : vector<3x32xf32> to vector<1x32xf32>
    %72 = vector.broadcast %71 : vector<1x32xf32> to vector<16x32xf32>
    %73 = arith.mulf %70, %72 : vector<16x32xf32>
    %74 = vector.extract_strided_slice %46 {offsets = [2, 0], sizes = [1, 32], strides = [1, 1]} : vector<3x32xf32> to vector<1x32xf32>
    %75 = vector.broadcast %74 : vector<1x32xf32> to vector<16x32xf32>
    %76 = arith.addf %73, %75 : vector<16x32xf32>
    %c0_30 = arith.constant 0 : index
    %c0_31 = arith.constant 0 : index
    %77 = vector.load %arg5[%c0_30, %c0_31] : memref<16x32xf32, #tpu.memory_space<vmem>>, vector<16x32xf32>
    tpu.vector_store %arg5[%c0_30, %c0_31], %76 {strides = array<i32>} : memref<16x32xf32, #tpu.memory_space<vmem>>, vector<16x32xf32>,
    return
  }
}

</mosaic_0001>

<bundles_post_ra>
// kernel: tpu_custom_call.1
= control target key start
LH: loop header
LB: loop body
LE: loop exit
PB: predicated region body
PF: predicated region fallthrough
CT: control target
= control target key end

     0   :  { %vm34_vm0 = vcmask 261120   ;;  %s559_s0 = inlined_call_operand.vmem [shape: f32[16,32], index: 0, kind: input, shape index: {}]   ;;  %s560_s1 = inlined_call_operand.vmem [shape: f32[32,128], index: 1, kind: input, shape index: {}]   ;;  %s561_s2 = inlined_call_operand.vmem [shape: f32[1,128], index: 2, kind: input, shape index: {}]   ;;  %s562_s3 = inlined_call_operand.vmem [shape: f32[128,32], index: 3, kind: input, shape index: {}]   ;;  %s563_s4 = inlined_call_operand.vmem [shape: f32[3,32], index: 4, kind: input, shape index: {}]   ;;  %s564_s5 = inlined_call_operand.hbm [shape: f32[16,32], index: 5, kind: output, shape index: {}]  }
   0x1   :  { %v26_v0 = vld [vmem:[%s560_s1 + $0x18] sm:$0xff]  ;;  %v25_v1 = vld [vmem:[%s560_s1 + $0x10] sm:$0xff]  ;;  %v477_v2 = vld [vmem:[%s559_s0] sm:$0xff] }
   0x2   :  { %352 = vmatprep.subr.mxu0 %v26_v0  ;;  %v24_v3 = vld [vmem:[%s560_s1 + $0x8] sm:$0xff]  ;;  %360 = vmatprep.mubr.msk.f32.mxu0 %vm34_vm0, %v477_v2 }
   0x3   :  { %353 = vmatpush3.msra.mxu0 %v26_v0 }
   0x4   :  { %10 = vsyncpa [#allocation3], 0  ;;  %354 = vmatprep.subr.mxu0 %v25_v1  ;;  %v23_v4 = vld [vmem:[%s560_s1] sm:$0xff]  ;;  %v490_v5 = vld [vmem:[%s559_s0 + $0x8] sm:$0xff] }
   0x5   :  { %355 = vmatpush3.msra.mxu0 %v25_v1  ;;  %v186_v6 = vld [vmem:[%s562_s3 + $0x78] sm:$0xff]  ;;  %v185_v7 = vld [vmem:[%s562_s3 + $0x70] sm:$0xff]  ;;  %v184_v8 = vld [vmem:[%s562_s3 + $0x68] sm:$0xff] }
   0x6   :  { %356 = vmatprep.subr.mxu0 %v24_v3  ;;  %363 = vmatprep.subr.mxu1 %v186_v6  ;;  %v183_v9 = vld [vmem:[%s562_s3 + $0x60] sm:$0xff]  ;;  %v182_v10 = vld [vmem:[%s562_s3 + $0x58] sm:$0xff]  ;;  %v181_v11 = vld [vmem:[%s562_s3 + $0x50] sm:$0xff] }
   0x7   :  { %357 = vmatpush3.msra.mxu0 %v24_v3  ;;  %364 = vmatpush3.msra.mxu1 %v186_v6  ;;  %v180_v12 = vld [vmem:[%s562_s3 + $0x48] sm:$0xff]  ;;  %v179_v13 = vld [vmem:[%s562_s3 + $0x40] sm:$0xff]  ;;  %v178_v14 = vld [vmem:[%s562_s3 + $0x38] sm:$0xff] }
   0x8   :  { %358 = vmatprep.subr.mxu0 %v23_v4  ;;  %365 = vmatprep.subr.mxu1 %v185_v7  ;;  %v177_v15 = vld [vmem:[%s562_s3 + $0x30] sm:$0xff]  ;;  %v176_v16 = vld [vmem:[%s562_s3 + $0x28] sm:$0xff]  ;;  %v175_v17 = vld [vmem:[%s562_s3 + $0x20] sm:$0xff] }
   0x9   :  { %359 = vmatpush3.msra.mxu0 %v23_v4  ;;  %366 = vmatpush3.msra.mxu1 %v185_v7  ;;  %v174_v18 = vld [vmem:[%s562_s3 + $0x18] sm:$0xff]  ;;  %v173_v19 = vld [vmem:[%s562_s3 + $0x10] sm:$0xff]  ;;  %v172_v20 = vld [vmem:[%s562_s3 + $0x8] sm:$0xff] }
   0xa   :  { %361 = vmatmul.mubr.msk.f32.vlgmr.msra.gmra.mxu0 %vm34_vm0, %v490_v5  ;;  %367 = vmatprep.subr.mxu1 %v184_v8  ;;  %v171_v21 = vld [vmem:[%s562_s3] sm:$0xff] }
   0xb   :  { %368 = vmatpush3.msra.mxu1 %v184_v8  ;;  %v325_v22 = vld [vmem:[%s561_s2] ss:$0 sm:$0xff] }
   0xc   :  { %369 = vmatprep.subr.mxu1 %v183_v9 }
   0xd   :  { %370 = vmatpush3.msra.mxu1 %v183_v9 }
   0xe   :  { %371 = vmatprep.subr.mxu1 %v182_v10 }
   0xf   :  { %372 = vmatpush3.msra.mxu1 %v182_v10 }
  0x10   :  { %373 = vmatprep.subr.mxu1 %v181_v11 }
  0x11   :  { %374 = vmatpush3.msra.mxu1 %v181_v11 }
  0x12   :  { %375 = vmatprep.subr.mxu1 %v180_v12 }
  0x13   :  { %376 = vmatpush3.msra.mxu1 %v180_v12 }
  0x14   :  { %377 = vmatprep.subr.mxu1 %v179_v13 }
  0x15   :  { %378 = vmatpush3.msra.mxu1 %v179_v13 }
  0x16   :  { %379 = vmatprep.subr.mxu1 %v178_v14 }
  0x17   :  { %380 = vmatpush3.msra.mxu1 %v178_v14 }
  0x18   :  { %381 = vmatprep.subr.mxu1 %v177_v15 }
  0x19   :  { %382 = vmatpush3.msra.mxu1 %v177_v15  ;;  %v187_v15 = vlaneseq }
  0x1a   :  { %383 = vmatprep.subr.mxu1 %v176_v16 }
  0x1b   :  { %384 = vmatpush3.msra.mxu1 %v176_v16  ;;  %v188_v16 = vshrl.u32 %v187_v15, 7 }
  0x1c   :  { %385 = vmatprep.subr.mxu1 %v175_v17 }
  0x1d   :  { %386 = vmatpush3.msra.mxu1 %v175_v17  ;;  %v189_v17 = vsub.s32 0, %v188_v16 }
  0x1e   :  { %387 = vmatprep.subr.mxu1 %v174_v18 }
  0x1f   :  { %388 = vmatpush3.msra.mxu1 %v174_v18  ;;  %v170_v18 = vld [vmem:[%s563_s4] sm:$0x7]  ;;  %s435_s4 = smov [#allocation2]  }
  0x20   :  { %389 = vmatprep.subr.mxu1 %v173_v19  ;;  %s314_s10 = sshll.u32 %s435_s4, 4  ;;  %s315_s10 = int_to_ptr.vmem [resolvable:$true] %s314_s10 }
  0x21   :  { %390 = vmatpush3.msra.mxu1 %v173_v19  ;;  %v190_v19 = vrot.slane %v170_v18, %v189_v17  ;;  %s413_s11 = scalar_lea.vmem %s315_s10, 256  ;;  %p418_p1 = scmp.lt.s32.totalorder %s315_s10, %s315_s10 }
  0x22   :  { %391 = vmatprep.subr.mxu1 %v172_v20  ;;  %p414_p0 = scmp.ne.s32.totalorder %s315_s10, %s413_s11  ;;  %p419_p2 = scmp.lt.s32.totalorder %s413_s11, %s413_s11 }
  0x23   :  { %392 = vmatpush3.msra.mxu1 %v172_v20 }
  0x24   :  { %393 = vmatprep.subr.mxu1 %v171_v21  ;;  %p420_p3 = por %p419_p2, %p418_p1 }
  0x25   :  { %394 = vmatpush3.msra.mxu1 %v171_v21 }
  0x26   :  { %p421_p4 = pnand %p420_p3, %p414_p0 }
  0xca   :  { %v362_v23 = vpop.f32.mrf.mxu0 }
  0xcb   :  { %v113_v24 = vadd.f32 %v362_v23, %v325_v22 }
  0xcc   :  { %v107_v25 = vpop.f32.mrf.mxu0 }
  0xcd   :  { %v119_v26 = vmul.f32 0.70710677, %v113_v24  ;;  %v108_v27 = vadd.f32 %v325_v22, %v107_v25  ;;  %v117_v12 = vmul.f32 0.5, %v113_v24 }
  0xcf   :  { %v121_v28 = vand.u32 2147483647, %v119_v26  ;;  %v118_v29 = vmul.f32 0.70710677, %v108_v27  ;;  %vm161_vm1 = vcmp.lt.f32.partialorder %v119_v26, 0.0  ;;  %v116_v10 = vmul.f32 0.5, %v108_v27 }
  0xd1   :  { %v123_v30 = vmul.f32 0.3275911, %v121_v28  ;;  %v120_v31 = vand.u32 2147483647, %v118_v29  ;;  %v149_v35 = vsub.f32 0.0, %v121_v28  ;;  %vm160_vm2 = vcmp.lt.f32.partialorder %v118_v29, 0.0 }
  0xd3   :  { %v125_v32 = vadd.f32 1.0, %v123_v30  ;;  %v122_v33 = vmul.f32 0.3275911, %v120_v31  ;;  %v148_v36 = vsub.f32 0.0, %v120_v31  ;;  %v151_v37 = vmul.f32 %v149_v35, %v121_v28 }
  0xd5   :  { %401 = vrcp.f32 %v125_v32  ;;  %v124_v34 = vadd.f32 1.0, %v122_v33  ;;  %v150_v39 = vmul.f32 %v148_v36, %v120_v31  ;;  %v154_v40 = vmul.f32 1.442695, %v151_v37 }
  0xd7   :  { %403 = vrcp.f32 %v124_v34  ;;  %v152_v44 = vmul.f32 1.442695, %v150_v39 }
  0xd8   :  { %405 = vpow2.f32 %v154_v40 }
  0xd9   :  { %407 = vpow2.f32 %v152_v44 }
  0xe2   :  { %v402_v38 = vpop.eup %401 }
  0xe3   :  { %v131_v41 = vmul.f32 1.0614054, %v402_v38 }
  0xe4   :  { %v404_v42 = vpop.eup %403 }
  0xe5   :  { %v133_v43 = vadd.f32 -1.4531521, %v131_v41  ;;  %v130_v45 = vmul.f32 1.0614054, %v404_v42  ;;  %v406_v59 = vpop.eup %405 }
  0xe6   :  { %v408_v63 = vpop.eup %407 }
  0xe7   :  { %v135_v46 = vmul.f32 %v402_v38, %v133_v43  ;;  %v132_v47 = vadd.f32 -1.4531521, %v130_v45  ;;  %v303_v43 = vsub.s32 2, %v188_v16 }
  0xe9   :  { %v137_v48 = vadd.f32 1.4214138, %v135_v46  ;;  %v134_v49 = vmul.f32 %v404_v42, %v132_v47  ;;  %v304_v46 = vrot.slane %v170_v18, %v303_v43 }
  0xeb   :  { %v139_v50 = vmul.f32 %v402_v38, %v137_v48  ;;  %v136_v51 = vadd.f32 1.4214138, %v134_v49 }
  0xed   :  { %v141_v52 = vadd.f32 -0.28449672, %v139_v50  ;;  %v138_v53 = vmul.f32 %v404_v42, %v136_v51 }
  0xef   :  { %v143_v54 = vmul.f32 %v402_v38, %v141_v52  ;;  %v140_v55 = vadd.f32 -0.28449672, %v138_v53 }
  0xf1   :  { %v145_v56 = vadd.f32 0.2548296, %v143_v54  ;;  %v142_v57 = vmul.f32 %v404_v42, %v140_v55 }
  0xf3   :  { %v147_v58 = vmul.f32 %v402_v38, %v145_v56  ;;  %v144_v60 = vadd.f32 0.2548296, %v142_v57 }
  0xf5   :  { %v157_v61 = vmul.f32 %v406_v59, %v147_v58  ;;  %v146_v62 = vmul.f32 %v404_v42, %v144_v60  ;;  %v297_v42 = vsub.s32 1, %v188_v16 }
  0xf7   :  { %v159_v0 = vsub.f32 1.0, %v157_v61  ;;  %v156_v1 = vmul.f32 %v408_v63, %v146_v62  ;;  %v298_v44 = vrot.slane %v170_v18, %v297_v42 }
  0xf9   :  { %v163_v3 = vsub.f32 0.0, %v159_v0  ;;  %v158_v4 = vsub.f32 1.0, %v156_v1 }
  0xfb   :  { %v165_v6 = vsel %vm161_vm1, %v163_v3, %v159_v0  ;;  %v162_v7 = vsub.f32 0.0, %v158_v4 }
  0xfc   :  { %v167_v9 = vadd.f32 1.0, %v165_v6 }
  0xfd   :  { %v164_v8 = vsel %vm160_vm2, %v162_v7, %v158_v4 }
  0xfe   :  { %v166_v11 = vadd.f32 1.0, %v164_v8  ;;  %v169_v14 = vmul.f32 %v167_v9, %v117_v12 }
 0x100   :  { %v168_v13 = vmul.f32 %v166_v11, %v116_v10 }
 0x102   :  { %395 = vmatprep.mubr.f32.mxu1 %v168_v13 }
 0x103   :  { %396 = vmatmul.mubr.f32.vlgmr.msra.gmra.mxu1 %v169_v14 }
 0x1c3   :  { %v397_v20 = vpop.f32.mrf.mxu1 }
 0x1c4   :  { %v263_v22 = vadd.f32 %v397_v20, %v190_v19 }
 0x1c5   :  { %v257_v21 = vpop.f32.mrf.mxu1 }
 0x1c6   :  { %v258_v23 = vadd.f32 %v257_v21, %v190_v19  ;;  %v267_v26 = vadd.f32 %v263_v22, %v490_v5 }
 0x1c8   :  { %v266_v25 = vadd.f32 %v258_v23, %v477_v2  ;;  %v271_v27 = vsel %vm34_vm0, %v267_v26, 0.0 }
 0x1ca   :  { %v268_v24 = vsel %vm34_vm0, %v266_v25, 0.0 }
 0x1cb   :  { %269 = vadd.xlane.f32.xlu0 %v268_v24 }
 0x1cf   :  { %272 = vadd.xlane.f32.xlu0 %v271_v27 }
 0x254   :  { %v270_v28 = vpop.xlane.xlu0 %269 }
 0x255   :  { %v275_v29 = vmul.f32 0.03125, %v270_v28 }
 0x257   :  { %v277_v30 = vsub.f32 %v266_v25, %v275_v29 }
 0x258   :  { %v273_v31 = vpop.xlane.xlu0 %272 }
 0x259   :  { %v276_v32 = vmul.f32 0.03125, %v273_v31  ;;  %v279_v33 = vmul.f32 %v277_v30, %v277_v30 }
 0x25b   :  { %v278_v34 = vsub.f32 %v267_v26, %v276_v32  ;;  %v281_v35 = vsel %vm34_vm0, %v279_v33, 0.0 }
 0x25c   :  { %282 = vadd.xlane.f32.xlu1 %v281_v35 }
 0x25d   :  { %v280_v36 = vmul.f32 %v278_v34, %v278_v34 }
 0x25f   :  { %v284_v2 = vsel %vm34_vm0, %v280_v36, 0.0 }
 0x260   :  { %285 = vadd.xlane.f32.xlu1 %v284_v2 }
 0x2e5   :  { %v283_v37 = vpop.xlane.xlu1 %282 }
 0x2e6   :  { %v287_v5 = vmul.f32 0.03125, %v283_v37 }
 0x2e8   :  { %v289_v38 = vadd.f32 1e-05, %v287_v5 }
 0x2e9   :  { %v286_v39 = vpop.xlane.xlu1 %285 }
 0x2ea   :  { %409 = vrsqrt.f32 %v289_v38  ;;  %v288_v40 = vmul.f32 0.03125, %v286_v39 }
 0x2ec   :  { %v290_v41 = vadd.f32 1e-05, %v288_v40 }
 0x2ee   :  { %411 = vrsqrt.f32 %v290_v41 }
 0x2f7   :  { %v410_v45 = vpop.eup %409 }
 0x2f8   :  { %v293_v47 = vmul.f32 %v410_v45, %v277_v30 }
 0x2fa   :  { %v299_v48 = vmul.f32 %v298_v44, %v293_v47 }
 0x2fb   :  { %v412_v49 = vpop.eup %411 }
 0x2fc   :  { %v294_v50 = vmul.f32 %v412_v49, %v278_v34  ;;  %v305_v51 = vadd.f32 %v304_v46, %v299_v48 }
 0x2fe   :  { %v300_v52 = vmul.f32 %v298_v44, %v294_v50  ;;  %307 = vst.msk [vmem:[#allocation2] sm:$0xff] %vm34_vm0, %v305_v51 }
 0x300   :  { %v306_v53 = vadd.f32 %v304_v46, %v300_v52 }
 0x302   :  { %308 = vst.msk [vmem:[#allocation2 + $0x8] sm:$0xff] %vm34_vm0, %v306_v53 }
 0x303   :  { %424 = shalt.err (!%p421_p4)
}
 0x304   :  { %s436_s12 = smov 128   ;;  %s437_s13 = smov 8  }
 0x305   :  { %320 = dma.vmem_to_hbm [thread:$0]  %s315_s10, 256, %s564_s5, [#allocation3], %s436_s12, %s436_s12, %s437_s13  }
 0x306   :  { %433 = dma.done.wait [#allocation3], 256  }
 0x307   :  { %434 = vsyncadd [#allocation3], 4294967040 }
 0x308   :  { %324 = vsyncpa [#allocation3], 1 }

</bundles_post_ra>
